<compile_context>
chip_gen: v6e
topology: v6e:2x2x1
jax: 0.10.0
libtpu: 0.0.40
codegen_flags: <defaults>
</compile_context>

<pallas_src>
import functools

import jax
import jax.numpy as jnp
from jax.experimental import pallas as pl
from jax.experimental.pallas import tpu as pltpu


# ----------------------------------------------------------------------------
# Kernel: one fused (TH*Wout, 9*Cin) x (9*Cin, Cout) MXU dot per output row tile.
# The input block is a phase-decomposed, halo'd row window, so every tap is a
# static contiguous slice - no dynamic indexing, no strided gathers.
# ----------------------------------------------------------------------------
def _conv3x3_kernel(x_ref, w_ref, b_ref, o_ref, lhs_ref, *,
                    stride, ext, th, wout, cin, cout, fold_out):
    # x_ref : (1, 1, s*s*(th+ext), Wq, Cin)  phased + halo'd input window
    # w_ref : (9*Cin, Cout)                  tap-major packed weights
    # b_ref : (1, Cout)                      bias (f32)
    # o_ref : (1, th, wout*cout) if fold_out else (1, th, wout, cout)
    # lhs_ref: VMEM scratch (th*wout, 9*Cin) - packed LHS slab
    for kh in range(3):
        for kw in range(3):
            rh, qh = kh % stride, kh // stride
            rw, qw = kw % stride, kw // stride
            ph = rh * stride + rw                    # phase plane
            row0 = ph * (th + ext) + qh              # static row offset
            tap = x_ref[0, 0, pl.ds(row0, th), pl.ds(qw, wout), :]
            t = kh * 3 + kw
            lhs_ref[:, t * cin:(t + 1) * cin] = tap.reshape(th * wout, cin)

    acc = jnp.dot(lhs_ref[...], w_ref[...], preferred_element_type=jnp.float32)
    y = acc + b_ref[...]                             # (th*wout, cout) f32
    if fold_out:
        o_ref[0] = y.reshape(th, wout * cout).astype(o_ref.dtype)
    else:
        o_ref[0] = y.reshape(th, wout, cout).astype(o_ref.dtype)


# ----------------------------------------------------------------------------
# Helpers
# ----------------------------------------------------------------------------
def _round_up(a, m):
    return -(-a // m) * m


def _vmem_capacity_bytes():
    try:
        cap = getattr(pltpu.get_tpu_info(), "vmem_capacity_bytes", None)
        if cap:
            return int(cap)
    except Exception:
        pass
    return 64 * 1024 * 1024          # conservative (v7x per-TC capacity)


def _pick_row_tile(hout, *, s, ext, wq, wout_pad, cin, cout, in_bytes, budget_bytes):
    """Largest 8-aligned output-row tile whose VMEM working set fits the budget."""
    hout_cap = min(512, _round_up(max(hout, 1), 8))
    fixed = (2 * s * s * ext * wq * cin * in_bytes   # halo rows of both input buffers
             + 2 * 9 * cin * cout * in_bytes         # weights (double-buffered)
             + 2 * cout * 4)                         # bias
    per_row = (2 * s * s * wq * cin * in_bytes       # input window, double-buffered
               + wout_pad * 9 * cin * in_bytes       # packed LHS scratch slab
               + wout_pad * cout * 4                 # f32 matmul result
               + 2 * wout_pad * cout * 4)            # output block, double-buffered
    th = (max(budget_bytes - fixed, 8 * per_row) // per_row) // 8 * 8
    return int(max(8, min(th, hout_cap)))


# ----------------------------------------------------------------------------
# Wrapper
# ----------------------------------------------------------------------------
def downsample_block_forward(x_nchw, weight, bias, *, stride, padding,
                             compute_dtype=jnp.bfloat16):
    """Forward of DownsampleBlock: y = Conv2d(Cin, Cout, 3, stride, padding)(x)."""
    N, Cin, H, W = map(int, x_nchw.shape)
    Cout = int(weight.shape[0])
    s, p = int(stride), int(padding)

    Hout = (H + 2 * p - 3) // s + 1
    Wout = (W + 2 * p - 3) // s + 1
    ext = 2 // s                                     # per-tile row/col halo (phased)
    wout_pad = _round_up(Wout, 8)                    # 8-aligned -> free per-tap reshape
    Wq = wout_pad + ext

    in_b = jnp.dtype(compute_dtype).itemsize
    vmem_cap = _vmem_capacity_bytes()
    budget = int(0.60 * vmem_cap)
    th = _pick_row_tile(Hout, s=s, ext=ext, wq=Wq, wout_pad=wout_pad,
                        cin=Cin, cout=Cout, in_bytes=in_b, budget_bytes=budget)
    hout_pad = _round_up(Hout, th)
    T = hout_pad // th
    Hq = hout_pad + ext
    R = s * s * (th + ext)

    # NCHW -> NHWC, cast once for the MXU, ONE fused zero-pad (conv pad + alignment).
    # TODO(synk): keep activations NHWC end-to-end in the surrounding model to drop
    # this transpose and the final one (two full HBM passes).
    x = jnp.transpose(x_nchw, (0, 2, 3, 1)).astype(compute_dtype)
    pad_r = max(0, s * Hq - H - p)
    pad_c = max(0, s * Wq - W - p)
    xp = jnp.pad(x, ((0, 0), (p, pad_r), (p, pad_c), (0, 0)))[:, :s * Hq, :s * Wq, :]

    # One gather: space-to-depth over the stride + per-row-tile windows with the
    # ext-row halo replicated, so each grid step gets an independent contiguous
    # (R, Wq, Cin) block (caps VMEM at two windows; both grid axes stay parallel).
    ph_ar = jnp.arange(s * s)
    r_ar = jnp.arange(th + ext)
    t_ar = jnp.arange(T)
    j_ar = jnp.arange(Wq)
    row_idx = (s * (t_ar[:, None, None] * th + r_ar[None, None, :])
               + (ph_ar // s)[None, :, None]).reshape(T, R)
    col_idx = jnp.broadcast_to(
        s * j_ar[None, None, :] + (ph_ar % s)[:, None, None],
        (s * s, th + ext, Wq)).reshape(R, Wq)
    x_win = xp[:, row_idx[:, :, None], col_idx[None, :, :], :]   # (N, T, R, Wq, Cin)

    # Torch (Cout, Cin, 3, 3) -> packed (9*Cin, Cout): one K = 9*Cin dot per tile.
    w_packed = (jnp.transpose(weight, (2, 3, 1, 0))
                .reshape(9 * Cin, Cout).astype(compute_dtype))
    b_row = bias.reshape(1, Cout).astype(jnp.float32)

    grid = (N, T)
    in_specs = [
        pl.BlockSpec((1, 1, R, Wq, Cin), lambda n, h: (n, h, 0, 0, 0)),
        # Weights/bias are tiny; single-buffering them (pl.Buffered(1)) would save
        # only a few KiB now that the image itself is row-windowed, so keep defaults.
        pl.BlockSpec((9 * Cin, Cout), lambda n, h: (0, 0)),
        pl.BlockSpec((1, Cout), lambda n, h: (0, 0)),
    ]
    scratch = [pltpu.VMEM((th * wout_pad, 9 * Cin), compute_dtype)]
    flops = 2 * N * hout_pad * wout_pad * Cout * 9 * Cin
    bytes_acc = int(x_win.size * in_b + w_packed.size * in_b
                    + N * hout_pad * wout_pad * Cout * 4)
    cparams = pltpu.CompilerParams(
        dimension_semantics=("parallel", "parallel"),
        vmem_limit_bytes=max(32 * 1024 * 1024, int(0.8 * vmem_cap)))

    def _run(fold_out):
        if fold_out:
            out_shape = jax.ShapeDtypeStruct((N, hout_pad, wout_pad * Cout), jnp.float32)
            out_spec = pl.BlockSpec((1, th, wout_pad * Cout), lambda n, h: (n, h, 0))
        else:
            out_shape = jax.ShapeDtypeStruct((N, hout_pad, wout_pad, Cout), jnp.float32)
            out_spec = pl.BlockSpec((1, th, wout_pad, Cout), lambda n, h: (n, h, 0, 0))
        kern = functools.partial(_conv3x3_kernel, stride=s, ext=ext, th=th,
                                 wout=wout_pad, cin=Cin, cout=Cout, fold_out=fold_out)
        return pl.pallas_call(
            kern,
            out_shape=out_shape,
            grid=grid,
            in_specs=in_specs,
            out_specs=out_spec,
            scratch_shapes=scratch,
            compiler_params=cparams,
            cost_estimate=pl.CostEstimate(flops=flops, transcendentals=0,
                                          bytes_accessed=bytes_acc),
        )(x_win, w_packed, b_row)

    # Lane-dense store (fold Wout into the lane dim) whenever Cout is not already a
    # multiple of 128; fall back to the dense-channel layout if this Mosaic build
    # rejects the minor-dim-merging reshape.
    fold_used = False
    out = None
    if (Cout % 128) != 0:
        try:
            out = jax.block_until_ready(_run(True))
            fold_used = True
        except Exception:
            out = None
    if out is None:
        out = _run(False)
    if fold_used:
        out = out.reshape(N, hout_pad, wout_pad, Cout)

    out = out[:, :Hout, :Wout, :]
    return jnp.transpose(out, (0, 3, 1, 2)).astype(jnp.float32)   # NHWC -> NCHW


# ----------------------------------------------------------------------------
if __name__ == "__main__":
    # DownsampleBlock(4 -> 8, stride=2, padding=1) on a small input.
    N, Cin, H, W = 2, 4, 16, 16
    Cout, stride, padding = 8, 2, 1

    key = jax.random.PRNGKey(0)
    kx, kw_, kb = jax.random.split(key, 3)
    x = jax.random.normal(kx, (N, Cin, H, W), jnp.float32)            # NCHW input
    weight = 0.1 * jax.random.normal(kw_, (Cout, Cin, 3, 3), jnp.float32)
    bias = 0.1 * jax.random.normal(kb, (Cout,), jnp.float32)

    # Pure-JAX reference (same semantics as torch.nn.Conv2d(3, stride, padding)).
    ref = jax.lax.conv_general_dilated(
        x, weight, window_strides=(stride, stride),
        padding=[(padding, padding), (padding, padding)],
        dimension_numbers=("NCHW", "OIHW", "NCHW"),
        precision=jax.lax.Precision.HIGHEST) + bias.reshape(1, Cout, 1, 1)

    Hout = (H + 2 * padding - 3) // stride + 1
    Wout = (W + 2 * padding - 3) // stride + 1

    # f32 compute path.
    out_f32 = jax.block_until_ready(
        downsample_block_forward(x, weight, bias, stride=stride, padding=padding,
                                 compute_dtype=jnp.float32))
    assert out_f32.shape == (N, Cout, Hout, Wout)
    assert bool(jnp.all(jnp.isfinite(out_f32)))
    assert jnp.allclose(out_f32, ref, atol=2e-2, rtol=2e-2)

    # Default bf16-operand / f32-accumulate path (recommended production config).
    out_bf16 = jax.block_until_ready(
        downsample_block_forward(x, weight, bias, stride=stride, padding=padding))
    assert out_bf16.shape == (N, Cout, Hout, Wout)
    assert bool(jnp.all(jnp.isfinite(out_bf16)))
    assert jnp.allclose(out_bf16, ref, atol=3e-2, rtol=3e-2)

    print("KERNEL_OK")
</pallas_src>

<mosaic_0001>
module attributes {stable_mosaic.version = 11 : i64} {
  func.func @_conv3x3_kernel(%arg0: i32, %arg1: i32, %arg2: memref<1x1x36x9x4xf32, #tpu.memory_space<vmem>>, %arg3: memref<36x8xf32, #tpu.memory_space<vmem>>, %arg4: memref<1x8xf32, #tpu.memory_space<vmem>>, %arg5: memref<1x8x64xf32, #tpu.memory_space<vmem>>, %arg6: memref<64x36xf32, #tpu.memory_space<vmem>>) attributes {dimension_semantics = [#tpu.dimension_semantics<parallel>, #tpu.dimension_semantics<parallel>], iteration_bounds = array<i64: 2, 1>, scalar_prefetch = 0 : i64, scratch_operands = 1 : i64, tpu.core_type = #tpu.core_type<tc>, window_params = [{transform_indices = @transform_0, window_bounds = array<i64: 1, 1, 36, 9, 4>}, {pipeline_mode = #tpu.pipeline_mode<synchronous>, transform_indices = @transform_1, window_bounds = array<i64: 36, 8>}, {pipeline_mode = #tpu.pipeline_mode<synchronous>, transform_indices = @transform_2, window_bounds = array<i64: 1, 8>}, {transform_indices = @transform_3, window_bounds = array<i64: 1, 8, 64>}]} {
    %c0 = arith.constant 0 : index
    %c0_0 = arith.constant 0 : index
    %c0_1 = arith.constant 0 : index
    %c0_2 = arith.constant 0 : index
    %c0_3 = arith.constant 0 : index
    %0 = vector.load %arg2[%c0, %c0_0, %c0_1, %c0_2, %c0_3] : memref<1x1x36x9x4xf32, #tpu.memory_space<vmem>>, vector<1x1x8x8x4xf32>
    %1 = vector.shape_cast %0 : vector<1x1x8x8x4xf32> to vector<8x8x4xf32>
    %2 = vector.shape_cast %1 : vector<8x8x4xf32> to vector<64x4xf32>
    %c0_4 = arith.constant 0 : index
    %c0_5 = arith.constant 0 : index
    %3 = vector.load %arg6[%c0_4, %c0_5] : memref<64x36xf32, #tpu.memory_space<vmem>>, vector<64x4xf32>
    tpu.vector_store %arg6[%c0_4, %c0_5], %2 {strides = array<i32>} : memref<64x36xf32, #tpu.memory_space<vmem>>, vector<64x4xf32>,
    %c0_6 = arith.constant 0 : index
    %c0_7 = arith.constant 0 : index
    %c9 = arith.constant 9 : index
    %c0_8 = arith.constant 0 : index
    %c0_9 = arith.constant 0 : index
    %4 = vector.load %arg2[%c0_6, %c0_7, %c9, %c0_8, %c0_9] : memref<1x1x36x9x4xf32, #tpu.memory_space<vmem>>, vector<1x1x8x8x4xf32>
    %5 = vector.shape_cast %4 : vector<1x1x8x8x4xf32> to vector<8x8x4xf32>
    %6 = vector.shape_cast %5 : vector<8x8x4xf32> to vector<64x4xf32>
    %c0_10 = arith.constant 0 : index
    %c4 = arith.constant 4 : index
    %7 = vector.load %arg6[%c0_10, %c4] : memref<64x36xf32, #tpu.memory_space<vmem>>, vector<64x4xf32>
    tpu.vector_store %arg6[%c0_10, %c4], %6 {strides = array<i32>} : memref<64x36xf32, #tpu.memory_space<vmem>>, vector<64x4xf32>,
    %c0_11 = arith.constant 0 : index
    %c0_12 = arith.constant 0 : index
    %c0_13 = arith.constant 0 : index
    %c1 = arith.constant 1 : index
    %c0_14 = arith.constant 0 : index
    %8 = vector.load %arg2[%c0_11, %c0_12, %c0_13, %c1, %c0_14] : memref<1x1x36x9x4xf32, #tpu.memory_space<vmem>>, vector<1x1x8x8x4xf32>
    %9 = vector.shape_cast %8 : vector<1x1x8x8x4xf32> to vector<8x8x4xf32>
    %10 = vector.shape_cast %9 : vector<8x8x4xf32> to vector<64x4xf32>
    %c0_15 = arith.constant 0 : index
    %c8 = arith.constant 8 : index
    %11 = vector.load %arg6[%c0_15, %c8] : memref<64x36xf32, #tpu.memory_space<vmem>>, vector<64x4xf32>
    tpu.vector_store %arg6[%c0_15, %c8], %10 {strides = array<i32>} : memref<64x36xf32, #tpu.memory_space<vmem>>, vector<64x4xf32>,
    %c0_16 = arith.constant 0 : index
    %c0_17 = arith.constant 0 : index
    %c18 = arith.constant 18 : index
    %c0_18 = arith.constant 0 : index
    %c0_19 = arith.constant 0 : index
    %12 = vector.load %arg2[%c0_16, %c0_17, %c18, %c0_18, %c0_19] : memref<1x1x36x9x4xf32, #tpu.memory_space<vmem>>, vector<1x1x8x8x4xf32>
    %13 = vector.shape_cast %12 : vector<1x1x8x8x4xf32> to vector<8x8x4xf32>
    %14 = vector.shape_cast %13 : vector<8x8x4xf32> to vector<64x4xf32>
    %c0_20 = arith.constant 0 : index
    %c12 = arith.constant 12 : index
    %15 = vector.load %arg6[%c0_20, %c12] : memref<64x36xf32, #tpu.memory_space<vmem>>, vector<64x4xf32>
    tpu.vector_store %arg6[%c0_20, %c12], %14 {strides = array<i32>} : memref<64x36xf32, #tpu.memory_space<vmem>>, vector<64x4xf32>,
    %c0_21 = arith.constant 0 : index
    %c0_22 = arith.constant 0 : index
    %c27 = arith.constant 27 : index
    %c0_23 = arith.constant 0 : index
    %c0_24 = arith.constant 0 : index
    %16 = vector.load %arg2[%c0_21, %c0_22, %c27, %c0_23, %c0_24] : memref<1x1x36x9x4xf32, #tpu.memory_space<vmem>>, vector<1x1x8x8x4xf32>
    %17 = vector.shape_cast %16 : vector<1x1x8x8x4xf32> to vector<8x8x4xf32>
    %18 = vector.shape_cast %17 : vector<8x8x4xf32> to vector<64x4xf32>
    %c0_25 = arith.constant 0 : index
    %c16 = arith.constant 16 : index
    %19 = vector.load %arg6[%c0_25, %c16] : memref<64x36xf32, #tpu.memory_space<vmem>>, vector<64x4xf32>
    tpu.vector_store %arg6[%c0_25, %c16], %18 {strides = array<i32>} : memref<64x36xf32, #tpu.memory_space<vmem>>, vector<64x4xf32>,
    %c0_26 = arith.constant 0 : index
    %c0_27 = arith.constant 0 : index
    %c18_28 = arith.constant 18 : index
    %c1_29 = arith.constant 1 : index
    %c0_30 = arith.constant 0 : index
    %20 = vector.load %arg2[%c0_26, %c0_27, %c18_28, %c1_29, %c0_30] : memref<1x1x36x9x4xf32, #tpu.memory_space<vmem>>, vector<1x1x8x8x4xf32>
    %21 = vector.shape_cast %20 : vector<1x1x8x8x4xf32> to vector<8x8x4xf32>
    %22 = vector.shape_cast %21 : vector<8x8x4xf32> to vector<64x4xf32>
    %c0_31 = arith.constant 0 : index
    %c20 = arith.constant 20 : index
    %23 = vector.load %arg6[%c0_31, %c20] : memref<64x36xf32, #tpu.memory_space<vmem>>, vector<64x4xf32>
    tpu.vector_store %arg6[%c0_31, %c20], %22 {strides = array<i32>} : memref<64x36xf32, #tpu.memory_space<vmem>>, vector<64x4xf32>,
    %c0_32 = arith.constant 0 : index
    %c0_33 = arith.constant 0 : index
    %c1_34 = arith.constant 1 : index
    %c0_35 = arith.constant 0 : index
    %c0_36 = arith.constant 0 : index
    %24 = vector.load %arg2[%c0_32, %c0_33, %c1_34, %c0_35, %c0_36] : memref<1x1x36x9x4xf32, #tpu.memory_space<vmem>>, vector<1x1x8x8x4xf32>
    %25 = vector.shape_cast %24 : vector<1x1x8x8x4xf32> to vector<8x8x4xf32>
    %26 = vector.shape_cast %25 : vector<8x8x4xf32> to vector<64x4xf32>
    %c0_37 = arith.constant 0 : index
    %c24 = arith.constant 24 : index
    %27 = vector.load %arg6[%c0_37, %c24] : memref<64x36xf32, #tpu.memory_space<vmem>>, vector<64x4xf32>
    tpu.vector_store %arg6[%c0_37, %c24], %26 {strides = array<i32>} : memref<64x36xf32, #tpu.memory_space<vmem>>, vector<64x4xf32>,
    %c0_38 = arith.constant 0 : index
    %c0_39 = arith.constant 0 : index
    %c10 = arith.constant 10 : index
    %c0_40 = arith.constant 0 : index
    %c0_41 = arith.constant 0 : index
    %28 = vector.load %arg2[%c0_38, %c0_39, %c10, %c0_40, %c0_41] : memref<1x1x36x9x4xf32, #tpu.memory_space<vmem>>, vector<1x1x8x8x4xf32>
    %29 = vector.shape_cast %28 : vector<1x1x8x8x4xf32> to vector<8x8x4xf32>
    %30 = vector.shape_cast %29 : vector<8x8x4xf32> to vector<64x4xf32>
    %c0_42 = arith.constant 0 : index
    %c28 = arith.constant 28 : index
    %31 = vector.load %arg6[%c0_42, %c28] : memref<64x36xf32, #tpu.memory_space<vmem>>, vector<64x4xf32>
    tpu.vector_store %arg6[%c0_42, %c28], %30 {strides = array<i32>} : memref<64x36xf32, #tpu.memory_space<vmem>>, vector<64x4xf32>,
    %c0_43 = arith.constant 0 : index
    %c0_44 = arith.constant 0 : index
    %c1_45 = arith.constant 1 : index
    %c1_46 = arith.constant 1 : index
    %c0_47 = arith.constant 0 : index
    %32 = vector.load %arg2[%c0_43, %c0_44, %c1_45, %c1_46, %c0_47] : memref<1x1x36x9x4xf32, #tpu.memory_space<vmem>>, vector<1x1x8x8x4xf32>
    %33 = vector.shape_cast %32 : vector<1x1x8x8x4xf32> to vector<8x8x4xf32>
    %34 = vector.shape_cast %33 : vector<8x8x4xf32> to vector<64x4xf32>
    %c0_48 = arith.constant 0 : index
    %c32 = arith.constant 32 : index
    %35 = vector.load %arg6[%c0_48, %c32] : memref<64x36xf32, #tpu.memory_space<vmem>>, vector<64x4xf32>
    tpu.vector_store %arg6[%c0_48, %c32], %34 {strides = array<i32>} : memref<64x36xf32, #tpu.memory_space<vmem>>, vector<64x4xf32>,
    %c0_49 = arith.constant 0 : index
    %c0_50 = arith.constant 0 : index
    %36 = vector.load %arg6[%c0_49, %c0_50] : memref<64x36xf32, #tpu.memory_space<vmem>>, vector<64x36xf32>
    %c0_51 = arith.constant 0 : index
    %c0_52 = arith.constant 0 : index
    %37 = vector.load %arg3[%c0_51, %c0_52] : memref<36x8xf32, #tpu.memory_space<vmem>>, vector<36x8xf32>
    %cst = arith.constant dense<0.000000e+00> : vector<64x8xf32>
    %38 = tpu.matmul %36, %37, %cst {dimension_numbers = #tpu.dot_dimension_numbers<[1], [0], [0], [1], [0, 0, 1, 1], [], []>} : vector<64x36xf32>, vector<36x8xf32>, vector<64x8xf32> -> vector<64x8xf32>
    %c0_53 = arith.constant 0 : index
    %c0_54 = arith.constant 0 : index
    %39 = vector.load %arg4[%c0_53, %c0_54] : memref<1x8xf32, #tpu.memory_space<vmem>>, vector<1x8xf32>
    %40 = vector.broadcast %39 : vector<1x8xf32> to vector<64x8xf32>
    %41 = arith.addf %38, %40 : vector<64x8xf32>
    %42 = vector.shape_cast %41 : vector<64x8xf32> to vector<8x64xf32>
    %c0_55 = arith.constant 0 : index
    %c0_56 = arith.constant 0 : index
    %c0_57 = arith.constant 0 : index
    %43 = vector.load %arg5[%c0_55, %c0_56, %c0_57] : memref<1x8x64xf32, #tpu.memory_space<vmem>>, vector<1x8x64xf32>
    %44 = vector.shape_cast %43 : vector<1x8x64xf32> to vector<8x64xf32>
    %45 = vector.shape_cast %42 : vector<8x64xf32> to vector<1x8x64xf32>
    tpu.vector_store %arg5[%c0_55, %c0_56, %c0_57], %45 {strides = array<i32>} : memref<1x8x64xf32, #tpu.memory_space<vmem>>, vector<1x8x64xf32>,
    return
  }
  func.func @transform_0(%arg0: i32, %arg1: i32) -> (i32, i32, i32, i32, i32) {
    %c0_i32 = arith.constant 0 : i32
    %c0_i32_0 = arith.constant 0 : i32
    %c0_i32_1 = arith.constant 0 : i32
    %c0_i32_2 = arith.constant 0 : i32
    return %arg0, %arg1, %c0_i32, %c0_i32_0, %c0_i32_1 : i32, i32, i32, i32, i32
  }
  func.func @transform_1(%arg0: i32, %arg1: i32) -> (i32, i32) {
    %c0_i32 = arith.constant 0 : i32
    %c0_i32_0 = arith.constant 0 : i32
    %c0_i32_1 = arith.constant 0 : i32
    return %c0_i32, %c0_i32_0 : i32, i32
  }
  func.func @transform_2(%arg0: i32, %arg1: i32) -> (i32, i32) {
    %c0_i32 = arith.constant 0 : i32
    %c0_i32_0 = arith.constant 0 : i32
    %c0_i32_1 = arith.constant 0 : i32
    return %c0_i32, %c0_i32_0 : i32, i32
  }
  func.func @transform_3(%arg0: i32, %arg1: i32) -> (i32, i32, i32) {
    %c0_i32 = arith.constant 0 : i32
    %c0_i32_0 = arith.constant 0 : i32
    return %arg0, %arg1, %c0_i32 : i32, i32, i32
  }
}

module attributes {stable_mosaic.version = 11 : i64} {
  func.func @_conv3x3_kernel(%arg0: i32, %arg1: i32, %arg2: memref<1x1x36x9x4xf32, #tpu.memory_space<vmem>>, %arg3: memref<36x8xf32, #tpu.memory_space<vmem>>, %arg4: memref<1x8xf32, #tpu.memory_space<vmem>>, %arg5: memref<1x8x8x8xf32, #tpu.memory_space<vmem>>, %arg6: memref<64x36xf32, #tpu.memory_space<vmem>>) attributes {dimension_semantics = [#tpu.dimension_semantics<parallel>, #tpu.dimension_semantics<parallel>], iteration_bounds = array<i64: 2, 1>, scalar_prefetch = 0 : i64, scratch_operands = 1 : i64, tpu.core_type = #tpu.core_type<tc>, window_params = [{transform_indices = @transform_0, window_bounds = array<i64: 1, 1, 36, 9, 4>}, {pipeline_mode = #tpu.pipeline_mode<synchronous>, transform_indices = @transform_1, window_bounds = array<i64: 36, 8>}, {pipeline_mode = #tpu.pipeline_mode<synchronous>, transform_indices = @transform_2, window_bounds = array<i64: 1, 8>}, {transform_indices = @transform_3, window_bounds = array<i64: 1, 8, 8, 8>}]} {
    %c0 = arith.constant 0 : index
    %c0_0 = arith.constant 0 : index
    %c0_1 = arith.constant 0 : index
    %c0_2 = arith.constant 0 : index
    %c0_3 = arith.constant 0 : index
    %0 = vector.load %arg2[%c0, %c0_0, %c0_1, %c0_2, %c0_3] : memref<1x1x36x9x4xf32, #tpu.memory_space<vmem>>, vector<1x1x8x8x4xf32>
    %1 = vector.shape_cast %0 : vector<1x1x8x8x4xf32> to vector<8x8x4xf32>
    %2 = vector.shape_cast %1 : vector<8x8x4xf32> to vector<64x4xf32>
    %c0_4 = arith.constant 0 : index
    %c0_5 = arith.constant 0 : index
    %3 = vector.load %arg6[%c0_4, %c0_5] : memref<64x36xf32, #tpu.memory_space<vmem>>, vector<64x4xf32>
    tpu.vector_store %arg6[%c0_4, %c0_5], %2 {strides = array<i32>} : memref<64x36xf32, #tpu.memory_space<vmem>>, vector<64x4xf32>,
    %c0_6 = arith.constant 0 : index
    %c0_7 = arith.constant 0 : index
    %c9 = arith.constant 9 : index
    %c0_8 = arith.constant 0 : index
    %c0_9 = arith.constant 0 : index
    %4 = vector.load %arg2[%c0_6, %c0_7, %c9, %c0_8, %c0_9] : memref<1x1x36x9x4xf32, #tpu.memory_space<vmem>>, vector<1x1x8x8x4xf32>
    %5 = vector.shape_cast %4 : vector<1x1x8x8x4xf32> to vector<8x8x4xf32>
    %6 = vector.shape_cast %5 : vector<8x8x4xf32> to vector<64x4xf32>
    %c0_10 = arith.constant 0 : index
    %c4 = arith.constant 4 : index
    %7 = vector.load %arg6[%c0_10, %c4] : memref<64x36xf32, #tpu.memory_space<vmem>>, vector<64x4xf32>
    tpu.vector_store %arg6[%c0_10, %c4], %6 {strides = array<i32>} : memref<64x36xf32, #tpu.memory_space<vmem>>, vector<64x4xf32>,
    %c0_11 = arith.constant 0 : index
    %c0_12 = arith.constant 0 : index
    %c0_13 = arith.constant 0 : index
    %c1 = arith.constant 1 : index
    %c0_14 = arith.constant 0 : index
    %8 = vector.load %arg2[%c0_11, %c0_12, %c0_13, %c1, %c0_14] : memref<1x1x36x9x4xf32, #tpu.memory_space<vmem>>, vector<1x1x8x8x4xf32>
    %9 = vector.shape_cast %8 : vector<1x1x8x8x4xf32> to vector<8x8x4xf32>
    %10 = vector.shape_cast %9 : vector<8x8x4xf32> to vector<64x4xf32>
    %c0_15 = arith.constant 0 : index
    %c8 = arith.constant 8 : index
    %11 = vector.load %arg6[%c0_15, %c8] : memref<64x36xf32, #tpu.memory_space<vmem>>, vector<64x4xf32>
    tpu.vector_store %arg6[%c0_15, %c8], %10 {strides = array<i32>} : memref<64x36xf32, #tpu.memory_space<vmem>>, vector<64x4xf32>,
    %c0_16 = arith.constant 0 : index
    %c0_17 = arith.constant 0 : index
    %c18 = arith.constant 18 : index
    %c0_18 = arith.constant 0 : index
    %c0_19 = arith.constant 0 : index
    %12 = vector.load %arg2[%c0_16, %c0_17, %c18, %c0_18, %c0_19] : memref<1x1x36x9x4xf32, #tpu.memory_space<vmem>>, vector<1x1x8x8x4xf32>
    %13 = vector.shape_cast %12 : vector<1x1x8x8x4xf32> to vector<8x8x4xf32>
    %14 = vector.shape_cast %13 : vector<8x8x4xf32> to vector<64x4xf32>
    %c0_20 = arith.constant 0 : index
    %c12 = arith.constant 12 : index
    %15 = vector.load %arg6[%c0_20, %c12] : memref<64x36xf32, #tpu.memory_space<vmem>>, vector<64x4xf32>
    tpu.vector_store %arg6[%c0_20, %c12], %14 {strides = array<i32>} : memref<64x36xf32, #tpu.memory_space<vmem>>, vector<64x4xf32>,
    %c0_21 = arith.constant 0 : index
    %c0_22 = arith.constant 0 : index
    %c27 = arith.constant 27 : index
    %c0_23 = arith.constant 0 : index
    %c0_24 = arith.constant 0 : index
    %16 = vector.load %arg2[%c0_21, %c0_22, %c27, %c0_23, %c0_24] : memref<1x1x36x9x4xf32, #tpu.memory_space<vmem>>, vector<1x1x8x8x4xf32>
    %17 = vector.shape_cast %16 : vector<1x1x8x8x4xf32> to vector<8x8x4xf32>
    %18 = vector.shape_cast %17 : vector<8x8x4xf32> to vector<64x4xf32>
    %c0_25 = arith.constant 0 : index
    %c16 = arith.constant 16 : index
    %19 = vector.load %arg6[%c0_25, %c16] : memref<64x36xf32, #tpu.memory_space<vmem>>, vector<64x4xf32>
    tpu.vector_store %arg6[%c0_25, %c16], %18 {strides = array<i32>} : memref<64x36xf32, #tpu.memory_space<vmem>>, vector<64x4xf32>,
    %c0_26 = arith.constant 0 : index
    %c0_27 = arith.constant 0 : index
    %c18_28 = arith.constant 18 : index
    %c1_29 = arith.constant 1 : index
    %c0_30 = arith.constant 0 : index
    %20 = vector.load %arg2[%c0_26, %c0_27, %c18_28, %c1_29, %c0_30] : memref<1x1x36x9x4xf32, #tpu.memory_space<vmem>>, vector<1x1x8x8x4xf32>
    %21 = vector.shape_cast %20 : vector<1x1x8x8x4xf32> to vector<8x8x4xf32>
    %22 = vector.shape_cast %21 : vector<8x8x4xf32> to vector<64x4xf32>
    %c0_31 = arith.constant 0 : index
    %c20 = arith.constant 20 : index
    %23 = vector.load %arg6[%c0_31, %c20] : memref<64x36xf32, #tpu.memory_space<vmem>>, vector<64x4xf32>
    tpu.vector_store %arg6[%c0_31, %c20], %22 {strides = array<i32>} : memref<64x36xf32, #tpu.memory_space<vmem>>, vector<64x4xf32>,
    %c0_32 = arith.constant 0 : index
    %c0_33 = arith.constant 0 : index
    %c1_34 = arith.constant 1 : index
    %c0_35 = arith.constant 0 : index
    %c0_36 = arith.constant 0 : index
    %24 = vector.load %arg2[%c0_32, %c0_33, %c1_34, %c0_35, %c0_36] : memref<1x1x36x9x4xf32, #tpu.memory_space<vmem>>, vector<1x1x8x8x4xf32>
    %25 = vector.shape_cast %24 : vector<1x1x8x8x4xf32> to vector<8x8x4xf32>
    %26 = vector.shape_cast %25 : vector<8x8x4xf32> to vector<64x4xf32>
    %c0_37 = arith.constant 0 : index
    %c24 = arith.constant 24 : index
    %27 = vector.load %arg6[%c0_37, %c24] : memref<64x36xf32, #tpu.memory_space<vmem>>, vector<64x4xf32>
    tpu.vector_store %arg6[%c0_37, %c24], %26 {strides = array<i32>} : memref<64x36xf32, #tpu.memory_space<vmem>>, vector<64x4xf32>,
    %c0_38 = arith.constant 0 : index
    %c0_39 = arith.constant 0 : index
    %c10 = arith.constant 10 : index
    %c0_40 = arith.constant 0 : index
    %c0_41 = arith.constant 0 : index
    %28 = vector.load %arg2[%c0_38, %c0_39, %c10, %c0_40, %c0_41] : memref<1x1x36x9x4xf32, #tpu.memory_space<vmem>>, vector<1x1x8x8x4xf32>
    %29 = vector.shape_cast %28 : vector<1x1x8x8x4xf32> to vector<8x8x4xf32>
    %30 = vector.shape_cast %29 : vector<8x8x4xf32> to vector<64x4xf32>
    %c0_42 = arith.constant 0 : index
    %c28 = arith.constant 28 : index
    %31 = vector.load %arg6[%c0_42, %c28] : memref<64x36xf32, #tpu.memory_space<vmem>>, vector<64x4xf32>
    tpu.vector_store %arg6[%c0_42, %c28], %30 {strides = array<i32>} : memref<64x36xf32, #tpu.memory_space<vmem>>, vector<64x4xf32>,
    %c0_43 = arith.constant 0 : index
    %c0_44 = arith.constant 0 : index
    %c1_45 = arith.constant 1 : index
    %c1_46 = arith.constant 1 : index
    %c0_47 = arith.constant 0 : index
    %32 = vector.load %arg2[%c0_43, %c0_44, %c1_45, %c1_46, %c0_47] : memref<1x1x36x9x4xf32, #tpu.memory_space<vmem>>, vector<1x1x8x8x4xf32>
    %33 = vector.shape_cast %32 : vector<1x1x8x8x4xf32> to vector<8x8x4xf32>
    %34 = vector.shape_cast %33 : vector<8x8x4xf32> to vector<64x4xf32>
    %c0_48 = arith.constant 0 : index
    %c32 = arith.constant 32 : index
    %35 = vector.load %arg6[%c0_48, %c32] : memref<64x36xf32, #tpu.memory_space<vmem>>, vector<64x4xf32>
    tpu.vector_store %arg6[%c0_48, %c32], %34 {strides = array<i32>} : memref<64x36xf32, #tpu.memory_space<vmem>>, vector<64x4xf32>,
    %c0_49 = arith.constant 0 : index
    %c0_50 = arith.constant 0 : index
    %36 = vector.load %arg6[%c0_49, %c0_50] : memref<64x36xf32, #tpu.memory_space<vmem>>, vector<64x36xf32>
    %c0_51 = arith.constant 0 : index
    %c0_52 = arith.constant 0 : index
    %37 = vector.load %arg3[%c0_51, %c0_52] : memref<36x8xf32, #tpu.memory_space<vmem>>, vector<36x8xf32>
    %cst = arith.constant dense<0.000000e+00> : vector<64x8xf32>
    %38 = tpu.matmul %36, %37, %cst {dimension_numbers = #tpu.dot_dimension_numbers<[1], [0], [0], [1], [0, 0, 1, 1], [], []>} : vector<64x36xf32>, vector<36x8xf32>, vector<64x8xf32> -> vector<64x8xf32>
    %c0_53 = arith.constant 0 : index
    %c0_54 = arith.constant 0 : index
    %39 = vector.load %arg4[%c0_53, %c0_54] : memref<1x8xf32, #tpu.memory_space<vmem>>, vector<1x8xf32>
    %40 = vector.broadcast %39 : vector<1x8xf32> to vector<64x8xf32>
    %41 = arith.addf %38, %40 : vector<64x8xf32>
    %42 = vector.shape_cast %41 : vector<64x8xf32> to vector<8x8x8xf32>
    %c0_55 = arith.constant 0 : index
    %c0_56 = arith.constant 0 : index
    %c0_57 = arith.constant 0 : index
    %c0_58 = arith.constant 0 : index
    %43 = vector.load %arg5[%c0_55, %c0_56, %c0_57, %c0_58] : memref<1x8x8x8xf32, #tpu.memory_space<vmem>>, vector<1x8x8x8xf32>
    %44 = vector.shape_cast %43 : vector<1x8x8x8xf32> to vector<8x8x8xf32>
    %45 = vector.shape_cast %42 : vector<8x8x8xf32> to vector<1x8x8x8xf32>
    tpu.vector_store %arg5[%c0_55, %c0_56, %c0_57, %c0_58], %45 {strides = array<i32>} : memref<1x8x8x8xf32, #tpu.memory_space<vmem>>, vector<1x8x8x8xf32>,
    return
  }
  func.func @transform_0(%arg0: i32, %arg1: i32) -> (i32, i32, i32, i32, i32) {
    %c0_i32 = arith.constant 0 : i32
    %c0_i32_0 = arith.constant 0 : i32
    %c0_i32_1 = arith.constant 0 : i32
    %c0_i32_2 = arith.constant 0 : i32
    return %arg0, %arg1, %c0_i32, %c0_i32_0, %c0_i32_1 : i32, i32, i32, i32, i32
  }
  func.func @transform_1(%arg0: i32, %arg1: i32) -> (i32, i32) {
    %c0_i32 = arith.constant 0 : i32
    %c0_i32_0 = arith.constant 0 : i32
    %c0_i32_1 = arith.constant 0 : i32
    return %c0_i32, %c0_i32_0 : i32, i32
  }
  func.func @transform_2(%arg0: i32, %arg1: i32) -> (i32, i32) {
    %c0_i32 = arith.constant 0 : i32
    %c0_i32_0 = arith.constant 0 : i32
    %c0_i32_1 = arith.constant 0 : i32
    return %c0_i32, %c0_i32_0 : i32, i32
  }
  func.func @transform_3(%arg0: i32, %arg1: i32) -> (i32, i32, i32, i32) {
    %c0_i32 = arith.constant 0 : i32
    %c0_i32_0 = arith.constant 0 : i32
    %c0_i32_1 = arith.constant 0 : i32
    return %arg0, %arg1, %c0_i32, %c0_i32_0 : i32, i32, i32, i32
  }
}

</mosaic_0001>

<bundles_post_ra>
// kernel: tpu_custom_call.1
= control target key start
LH: loop header
LB: loop body
LE: loop exit
PB: predicated region body
PF: predicated region fallthrough
CT: control target
= control target key end

     0   :  { %8 = vsyncpa [#allocation4], 0  ;;  %s1580_s0 = inlined_call_operand.vmem [shape: f32[2,1,36,9,4], index: 0, kind: input, shape index: {}]   ;;  %s1581_s1 = inlined_call_operand.vmem [shape: f32[36,8], index: 1, kind: input, shape index: {}]   ;;  %s1582_s2 = inlined_call_operand.vmem [shape: f32[1,8], index: 2, kind: input, shape index: {}]   ;;  %s1583_s3 = inlined_call_operand.hbm [shape: f32[2,8,8,8], index: 3, kind: output, shape index: {}]  }
   0x1   :  { %10 = vsyncpa [#allocation4 + $0x1], 0  ;;  %s1170_s12 = smov 0   ;;  %s1172_s13 = smov 0  }
   0x2   :  { %s1174_s14 = smov 0   ;;  %s1176_s15 = smov 0  }
   0x3   :  { %s1178_s16 = smov 0   ;;  %s1180_s17 = smov 0  }
   0x4 LB: > { %s873_s18 = sadd.s32 4294967295, %s1138_s17   ;;  %s874_s19 = sadd.s32 4294967294, %s1138_s17   ;;  %s1138_s17 = sphi %s1180_s17, %s16_s17   ;;  %s1134_s16 = sphi %s1178_s16, %s1590_s16   ;;  %s1130_s15 = sphi %s1176_s15, %s1589_s15   ;;  %s1126_s14 = sphi %s1174_s14, %s1588_s14   ;;  %s1122_s13 = sphi %s1172_s13, %s1587_s13   ;;  %s1118_s12 = sphi %s1170_s12, %s1586_s12  }
   0x5   : > { %s28_s20 = sadd.s32 1, %s1134_s16  ;;  %s107_s21 = sadd.s32 1, %s1126_s14 }
   0x6   : > { %p30_p0 = scmp.ge.s32.totalorder %s28_s20, 2  ;;  %p117_p1 = scmp.ne.s32.totalorder %s1126_s14, %s1122_s13 }
   0x7   : > { %p118_p2 = scmp.eq.s32.totalorder %s873_s18, 1  ;;  %p123_p3 = scmp.ne.s32.totalorder %s1122_s13, %s1118_s12 }
   0x8   : > { %s1592_s20 = smov (%p30_p0, %s28_s20), 0  ;;  %p124_p5 = scmp.eq.s32.totalorder %s874_s19, 1 }
   0x9   : > { %p1210_p4 = por %p118_p2, %p117_p1  ;;  %s102_s23 = ssub.s32 %s1134_s16, %s1592_s20 }
   0xa   : > { %p877_p6 = scmp.ge.s32.totalorder %s1138_s17, 1  ;;  %p105_p7 = scmp.eq.s32.totalorder %s102_s23, 0 }
   0xb   : > { %p1217_p8 = por %p124_p5, %p123_p3  ;;  %p160_p9 = scmp.lt.s32.totalorder %s1138_s17, 3 }
   0xc   : > { %s1223_s25 = scalar_select %p105_p7, %s1126_s14, %s107_s21  }
   0xd   : > { %p161_p10 = pnand %p877_p6, %p160_p9 }
   0xe   : > { %p188_p11 = scmp.lt.s32.totalorder (!%p161_p10), %s1130_s15, 1  ;;  %s1140_s4 = smov (!%p161_p10), 4  }
   0xf   : > { %164 = sbr.rel (%p161_p10) target bundleno = 485 (0x1e5), region = 32  ;;  %s1141_s5 = smov (!%p161_p10), 8  }
  0x10   : > { %s1142_s6 = smov (!%p161_p10), 12   ;;  %s1143_s7 = smov (!%p161_p10), 16  }
  0x11   : > { %s1144_s8 = smov (!%p161_p10), 20   ;;  %s1145_s9 = smov (!%p161_p10), 24  }
  0x12   : > { %s1146_s10 = smov (!%p161_p10), 28   ;;  %s951_s11 = sshll.u32 (!%p161_p10), %s1130_s15, 10 }
  0x13   : > { %s1524_s23 = scalar_lea.hbm (!%p161_p10), %s1583_s3, %s951_s11 }
  0x14   : > { %s189_s26 = scalar_select %p188_p11, %s1130_s15, 1  ;;  %vm206_vm0 = vcmask 31744   ;;  %v624_v42 = vld [vmem:[%s1581_s1 + $0x20] sm:$0xf]  ;;  %vm657_vm1 = vcmask 1043456   ;;  %v623_v43 = vld [vmem:[%s1581_s1 + $0x18] sm:$0xff] }
  0x15   : > { %965 = vmatprep.subr.msk.mxu0 %vm657_vm1, %v624_v42  ;;  %987 = vmatprep.subr.msk.mxu1 %vm657_vm1, %v624_v42  ;;  %v622_v44 = vld [vmem:[%s1581_s1 + $0x10] sm:$0xff]  ;;  %v621_v47 = vld [vmem:[%s1581_s1 + $0x8] sm:$0xff]  ;;  %v620_v48 = vld [vmem:[%s1581_s1] sm:$0xff]  ;;  %vm256_vm2 = vcmask 64544   ;;  %vm305_vm3 = vcmask 97344   ;;  %vm355_vm4 = vcmask 130144  }
  0x16   : > { %s997_s27 = smul.u32 576, %s189_s26  ;;  %966 = vmatpush3.msk.msra.mxu0 %vm657_vm1, %v624_v42  ;;  %992 = vmatpush3.msk.msra.mxu1 %vm657_vm1, %v624_v42  ;;  %vm405_vm5 = vcmask 162944   ;;  %vm454_vm6 = vcmask 195744   ;;  %vm504_vm7 = vcmask 228544   ;;  %vm554_vm8 = vcmask 261344  }
  0x17   : > { %967 = vmatprep.subr.mxu0 %v623_v43  ;;  %988 = vmatprep.subr.mxu1 %v623_v43  ;;  %vm603_vm9 = vcmask 294144   ;;  %vm632_vm10 = vcmask 293888   ;;  %vm766_vm11 = vcmask 64512  }
  0x18   : > { %s1230_s30 = scalar_lea.vmem %s1580_s0, %s997_s27  ;;  %s1147_s27 = smov 32   ;;  %968 = vmatpush3.msra.mxu0 %v623_v43  ;;  %993 = vmatpush3.msra.mxu1 %v623_v43 }
  0x19   : > { %v1233_v0 = vld [vmem:[%s1230_s30 + $0xa0] sm:$0xff]  ;;  %v880_v1 = vld [vmem:[%s1230_s30 + $0x90] sm:$0xff]  ;;  %969 = vmatprep.subr.mxu0 %v622_v44  ;;  %989 = vmatprep.subr.mxu1 %v622_v44 }
  0x1a   : > { %234 = vrot.lane.b32.xlu1 %v1233_v0, %s1140_s4  ;;  %232 = vrot.lane.b32.xlu0 %v880_v1, %s1140_s4  ;;  %v1240_v2 = vld [vmem:[%s1230_s30 + $0xe0] sm:$0xff]  ;;  %v1243_v3 = vld [vmem:[%s1230_s30 + $0xd0] sm:$0xff] }
  0x1b   : > { %v1250_v4 = vld [vmem:[%s1230_s30 + $0x41] sm:$0xff]  ;;  %v916_v6 = vld [vmem:[%s1230_s30 + $0x50] sm:$0xff]  ;;  %970 = vmatpush3.msra.mxu0 %v622_v44  ;;  %994 = vmatpush3.msra.mxu1 %v622_v44 }
  0x1c   : > { %v265_v5 = vld [vmem:[%s1230_s30 + $0x1] sm:$0xff]  ;;  %v1258_v7 = vld [vmem:[%s1230_s30 + $0x51] sm:$0xff]  ;;  %212 = vst.msk [vmem:[#allocation2 + $0x28] sm:$0xff] %vm206_vm0, %v916_v6  ;;  %971 = vmatprep.subr.mxu0 %v621_v47  ;;  %990 = vmatprep.subr.mxu1 %v621_v47 }
  0x1d   : > { %v1261_v8 = vld [vmem:[%s1230_s30 + $0x11] sm:$0xff]  ;;  %v1266_v10 = vld [vmem:[%s1230_s30 + $0x60] sm:$0xff]  ;;  %972 = vmatpush3.msra.mxu0 %v621_v47  ;;  %995 = vmatpush3.msra.mxu1 %v621_v47 }
  0x1e   : > { %242 = vrot.lane.b32.xlu1 %v1240_v2, %s1140_s4  ;;  %240 = vrot.lane.b32.xlu0 %v1243_v3, %s1140_s4  ;;  %v912_v9 = vld [vmem:[%s1230_s30 + $0x10] sm:$0xff]  ;;  %v1270_v11 = vld [vmem:[%s1230_s30 + $0x20] sm:$0xff]  ;;  %213 = vst.msk [vmem:[#allocation2 + $0x30] sm:$0xff] %vm206_vm0, %v1266_v10 }
  0x1f   : > { %208 = vst.msk [vmem:[#allocation2 + $0x8] sm:$0xff] %vm206_vm0, %v912_v9  ;;  %209 = vst.msk [vmem:[#allocation2 + $0x10] sm:$0xff] %vm206_vm0, %v1270_v11  ;;  %v892_v12 = vld [vmem:[%s1230_s30 + $0x160] sm:$0xff]  ;;  %v1283_v14 = vld [vmem:[%s1230_s30 + $0x70] sm:$0xff]  ;;  %973 = vmatprep.subr.mxu0 %v620_v48  ;;  %991 = vmatprep.subr.mxu1 %v620_v48 }
  0x20   : > { %v888_v13 = vld [vmem:[%s1230_s30 + $0x120] sm:$0xff]  ;;  %v1286_v15 = vld [vmem:[%s1230_s30 + $0x30] sm:$0xff]  ;;  %214 = vst.msk [vmem:[#allocation2 + $0x38] sm:$0xff] %vm206_vm0, %v1283_v14  ;;  %974 = vmatpush3.msra.mxu0 %v620_v48  ;;  %996 = vmatpush3.msra.mxu1 %v620_v48 }
  0x21   : > { %v1291_v16 = vld [vmem:[%s1230_s30 + $0x40] sm:$0xff]  ;;  %210 = vst.msk [vmem:[#allocation2 + $0x18] sm:$0xff] %vm206_vm0, %v1286_v15  ;;  %v893_v18 = vld [vmem:[%s1230_s30 + $0x170] sm:$0xff] }
  0x22   : > { %289 = vrot.lane.b32.xlu1 %v1250_v4, %s1141_s5  ;;  %281 = vrot.lane.b32.xlu0 %v265_v5, %s1141_s5  ;;  %v198_v17 = vld [vmem:[%s1230_s30] sm:$0xff]  ;;  %v889_v19 = vld [vmem:[%s1230_s30 + $0x130] sm:$0xff]  ;;  %211 = vst.msk [vmem:[#allocation2 + $0x20] sm:$0xff] %vm206_vm0, %v1291_v16 }
  0x23   : > { %207 = vst.msk [vmem:[#allocation2] sm:$0xff] %vm206_vm0, %v198_v17  ;;  %v900_v20 = vld [vmem:[%s1230_s30 + $0x1f0] sm:$0xff]  ;;  %v901_v24 = vld [vmem:[%s1230_s30 + $0x200] sm:$0xff] }
  0x24   : > { %v896_v21 = vld [vmem:[%s1230_s30 + $0x1b0] sm:$0xff]  ;;  %v897_v25 = vld [vmem:[%s1230_s30 + $0x1c0] sm:$0xff] }
  0x25   : > { %v886_v22 = vld [vmem:[%s1230_s30 + $0xf0] sm:$0xff]  ;;  %v908_v26 = vld [vmem:[%s1230_s30 + $0x161] sm:$0xff] }
  0x26   : > { %291 = vrot.lane.b32.xlu1 %v1258_v7, %s1141_s5  ;;  %283 = vrot.lane.b32.xlu0 %v1261_v8, %s1141_s5  ;;  %v882_v23 = vld [vmem:[%s1230_s30 + $0xb0] sm:$0xff]  ;;  %v904_v27 = vld [vmem:[%s1230_s30 + $0x121] sm:$0xff] }
  0x27   : > { %v1322_v28 = vld [vmem:[%s1230_s30 + $0x100] sm:$0xff]  ;;  %v909_v32 = vld [vmem:[%s1230_s30 + $0x171] sm:$0xff] }
  0x28   : > { %v1325_v29 = vld [vmem:[%s1230_s30 + $0xc0] sm:$0xff]  ;;  %v905_v33 = vld [vmem:[%s1230_s30 + $0x131] sm:$0xff] }
  0x29   : > { %v1332_v30 = vld [vmem:[%s1230_s30 + $0x61] sm:$0xff]  ;;  %v1348_v34 = vld [vmem:[%s1230_s30 + $0x71] sm:$0xff] }
  0x2a   : > { %339 = vrot.lane.b32.xlu1 %v892_v12, %s1142_s6  ;;  %331 = vrot.lane.b32.xlu0 %v888_v13, %s1142_s6  ;;  %v1335_v31 = vld [vmem:[%s1230_s30 + $0x21] sm:$0xff]  ;;  %v1351_v35 = vld [vmem:[%s1230_s30 + $0x31] sm:$0xff] }
  0x2b   : > { %v894_v36 = vld [vmem:[%s1230_s30 + $0x180] sm:$0xff]  ;;  %v895_v38 = vld [vmem:[%s1230_s30 + $0x190] sm:$0xff] }
  0x2c   : > { %v890_v37 = vld [vmem:[%s1230_s30 + $0x140] sm:$0xff]  ;;  %v891_v39 = vld [vmem:[%s1230_s30 + $0x150] sm:$0xff] }
  0x2d   : > { %v902_v40 = vld [vmem:[%s1230_s30 + $0x210] sm:$0xff]  ;;  %v903_v45 = vld [vmem:[%s1230_s30 + $0x220] sm:$0xff] }
  0x2e   : > { %341 = vrot.lane.b32.xlu1 %v893_v18, %s1142_s6  ;;  %333 = vrot.lane.b32.xlu0 %v889_v19, %s1142_s6  ;;  %v898_v41 = vld [vmem:[%s1230_s30 + $0x1d0] sm:$0xff]  ;;  %v899_v46 = vld [vmem:[%s1230_s30 + $0x1e0] sm:$0xff] }
  0x2f   : > { %v910_v49 = vld [vmem:[%s1230_s30 + $0x181] sm:$0xff]  ;;  %v911_v51 = vld [vmem:[%s1230_s30 + $0x191] sm:$0xff] }
  0x30   : > { %v906_v50 = vld [vmem:[%s1230_s30 + $0x141] sm:$0xff]  ;;  %v907_v52 = vld [vmem:[%s1230_s30 + $0x151] sm:$0xff] }
  0x31   : > { %v919_v53 = vld [vmem:[%s1230_s30 + $0x80] sm:$0xff]  ;;  %v927_v54 = vld [vmem:[%s1230_s30 + $0x110] sm:$0xff] }
  0x32   : > { %389 = vrot.lane.b32.xlu1 %v900_v20, %s1143_s7  ;;  %381 = vrot.lane.b32.xlu0 %v896_v21, %s1143_s7  ;;  %v935_v59 = vld [vmem:[%s1230_s30 + $0x81] sm:$0xff]  ;;  %s185_s30 = sand.u32 1, %s1122_s13  }
  0x33   : > { %s1534_s15 = scalar_lea.sflag [#allocation4], %s185_s30 }
  0x36   : > { %244 = vrot.lane.b32.xlu1 %v886_v22, %s1140_s4  ;;  %236 = vrot.lane.b32.xlu0 %v882_v23, %s1140_s4 }
  0x3a   : > { %391 = vrot.lane.b32.xlu1 %v901_v24, %s1143_s7  ;;  %383 = vrot.lane.b32.xlu0 %v897_v25, %s1143_s7 }
  0x3e   : > { %438 = vrot.lane.b32.xlu1 %v908_v26, %s1144_s8  ;;  %430 = vrot.lane.b32.xlu0 %v904_v27, %s1144_s8 }
  0x42   : > { %246 = vrot.lane.b32.xlu1 %v1322_v28, %s1140_s4  ;;  %238 = vrot.lane.b32.xlu0 %v1325_v29, %s1140_s4 }
  0x46   : > { %293 = vrot.lane.b32.xlu1 %v1332_v30, %s1141_s5  ;;  %285 = vrot.lane.b32.xlu0 %v1335_v31, %s1141_s5 }
  0x4a   : > { %440 = vrot.lane.b32.xlu1 %v909_v32, %s1144_s8  ;;  %432 = vrot.lane.b32.xlu0 %v905_v33, %s1144_s8 }
  0x4e   : > { %488 = vrot.lane.b32.xlu1 %v916_v6, %s1145_s9  ;;  %480 = vrot.lane.b32.xlu0 %v912_v9, %s1145_s9 }
  0x52   : > { %295 = vrot.lane.b32.xlu1 %v1348_v34, %s1141_s5  ;;  %287 = vrot.lane.b32.xlu0 %v1351_v35, %s1141_s5 }
  0x56   : > { %343 = vrot.lane.b32.xlu1 %v894_v36, %s1142_s6  ;;  %335 = vrot.lane.b32.xlu0 %v890_v37, %s1142_s6 }
  0x5a   : > { %490 = vrot.lane.b32.xlu1 %v1266_v10, %s1145_s9  ;;  %482 = vrot.lane.b32.xlu0 %v1270_v11, %s1145_s9 }
  0x5e   : > { %538 = vrot.lane.b32.xlu1 %v1240_v2, %s1146_s10  ;;  %530 = vrot.lane.b32.xlu0 %v1233_v0, %s1146_s10 }
  0x62   : > { %345 = vrot.lane.b32.xlu1 %v895_v38, %s1142_s6  ;;  %337 = vrot.lane.b32.xlu0 %v891_v39, %s1142_s6 }
  0x66   : > { %393 = vrot.lane.b32.xlu1 %v902_v40, %s1143_s7  ;;  %385 = vrot.lane.b32.xlu0 %v898_v41, %s1143_s7 }
  0x6a   : > { %540 = vrot.lane.b32.xlu1 %v886_v22, %s1146_s10  ;;  %532 = vrot.lane.b32.xlu0 %v882_v23, %s1146_s10 }
  0x6e   : > { %587 = vrot.lane.b32.xlu1 %v1258_v7, %s1147_s27  ;;  %579 = vrot.lane.b32.xlu0 %v1261_v8, %s1147_s27 }
  0x72   : > { %395 = vrot.lane.b32.xlu1 %v903_v45, %s1143_s7  ;;  %387 = vrot.lane.b32.xlu0 %v899_v46, %s1143_s7  ;;  %s878_s7 = sshll.u32 %s185_s30, 6 }
  0x76   : > { %442 = vrot.lane.b32.xlu1 %v910_v49, %s1144_s8  ;;  %434 = vrot.lane.b32.xlu0 %v906_v50, %s1144_s8 }
  0x7a   : > { %589 = vrot.lane.b32.xlu1 %v1332_v30, %s1147_s27  ;;  %581 = vrot.lane.b32.xlu0 %v1335_v31, %s1147_s27 }
  0x7e   : > { %444 = vrot.lane.b32.xlu1 %v911_v51, %s1144_s8  ;;  %436 = vrot.lane.b32.xlu0 %v907_v52, %s1144_s8 }
  0x82   : > { %492 = vrot.lane.b32.xlu1 %v1283_v14, %s1145_s9  ;;  %484 = vrot.lane.b32.xlu0 %v1286_v15, %s1145_s9 }
  0x86   : > { %494 = vrot.lane.b32.xlu1 %v919_v53, %s1145_s9  ;;  %486 = vrot.lane.b32.xlu0 %v1291_v16, %s1145_s9 }
  0x8a   : > { %542 = vrot.lane.b32.xlu1 %v1322_v28, %s1146_s10  ;;  %534 = vrot.lane.b32.xlu0 %v1325_v29, %s1146_s10 }
  0x8c   : > { %v235_v55 = vpop.permute.xlu1 %234  ;;  %v233_v56 = vpop.permute.xlu0 %232 }
  0x8d   : > { %258 = vst.msk [vmem:[#allocation2 + $0x8] sm:$0xff] %vm256_vm2, %v235_v55  ;;  %257 = vst.msk [vmem:[#allocation2] sm:$0xff] %vm256_vm2, %v233_v56 }
  0x8e   : > { %544 = vrot.lane.b32.xlu1 %v927_v54, %s1146_s10  ;;  %536 = vrot.lane.b32.xlu0 %v1243_v3, %s1146_s10  ;;  %s187_s10 = scalar_lea.vmem [#allocation3], %s878_s7 }
  0x8f   : > { %s791_s18 = sshll.u32 %s187_s10, 4  ;;  %s1528_s18 = int_to_ptr.vmem [resolvable:$true] %s791_s18 }
  0x90   : > { %v243_v57 = vpop.permute.xlu1 %242  ;;  %v241_v58 = vpop.permute.xlu0 %240  ;;  %s1062_s26 = scalar_lea.vmem %s1528_s18, 1024 }
  0x91   : > { %262 = vst.msk [vmem:[#allocation2 + $0x28] sm:$0xff] %vm256_vm2, %v243_v57  ;;  %261 = vst.msk [vmem:[#allocation2 + $0x20] sm:$0xff] %vm256_vm2, %v241_v58  ;;  %p1063_p12 = scmp.ne.s32.totalorder %s1528_s18, %s1062_s26 }
  0x92   : > { %591 = vrot.lane.b32.xlu1 %v1348_v34, %s1147_s27  ;;  %583 = vrot.lane.b32.xlu0 %v1351_v35, %s1147_s27 }
  0x93   : > { %p1064_p13 = pnand %p1063_p12, %p1210_p4 }
  0x94   : > { %v290_v60 = vpop.permute.xlu1 %289  ;;  %v282_v61 = vpop.permute.xlu0 %281 }
  0x95   : > { %310 = vst.msk [vmem:[#allocation2 + $0x20] sm:$0xff] %vm305_vm3, %v290_v60  ;;  %306 = vst.msk [vmem:[#allocation2] sm:$0xff] %vm305_vm3, %v282_v61  ;;  %p1065_p0 = pneg %p1064_p13 }
  0x96   : > { %593 = vrot.lane.b32.xlu1 %v935_v59, %s1147_s27  ;;  %585 = vrot.lane.b32.xlu0 %v1250_v4, %s1147_s27  ;;  %s1148_s27 = smov [#allocation3]  }
  0x97   : > { %s1066_s28 = sshll.u32 %s1148_s27, 4  ;;  %s1067_s28 = int_to_ptr.vmem [resolvable:$false] %s1066_s28 }
  0x98   : > { %v292_v62 = vpop.permute.xlu1 %291  ;;  %v284_v63 = vpop.permute.xlu0 %283  ;;  %s1068_s29 = scalar_lea.vmem %s1067_s28, 2048  ;;  %p1069_p1 = scmp.lt.s32.totalorder %s1528_s18, %s1067_s28 }
  0x99   : > { %311 = vst.msk [vmem:[#allocation2 + $0x28] sm:$0xff] %vm305_vm3, %v292_v62  ;;  %307 = vst.msk [vmem:[#allocation2 + $0x8] sm:$0xff] %vm305_vm3, %v284_v63  ;;  %p1070_p2 = scmp.lt.s32.totalorder %s1068_s29, %s1062_s26 }
  0x9b   : > { %p1071_p3 = por %p1070_p2, %p1069_p1 }
  0x9c   : > { %v340_v0 = vpop.permute.xlu1 %339  ;;  %v332_v1 = vpop.permute.xlu0 %331 }
  0x9d   : > { %360 = vst.msk [vmem:[#allocation2 + $0x20] sm:$0xff] %vm355_vm4, %v340_v0  ;;  %356 = vst.msk [vmem:[#allocation2] sm:$0xff] %vm355_vm4, %v332_v1  ;;  %v936_v0 = vld [vmem:[%s1582_s2] ss:$0 sm:$0xff]  ;;  %p1072_p5 = pnand %p1071_p3, %p1065_p0 }
  0xa0   : > { %v342_v2 = vpop.permute.xlu1 %341  ;;  %v334_v3 = vpop.permute.xlu0 %333 }
  0xa1   : > { %361 = vst.msk [vmem:[#allocation2 + $0x28] sm:$0xff] %vm355_vm4, %v342_v2  ;;  %357 = vst.msk [vmem:[#allocation2 + $0x8] sm:$0xff] %vm355_vm4, %v334_v3 }
  0xa4   : > { %v390_v4 = vpop.permute.xlu1 %389  ;;  %v382_v5 = vpop.permute.xlu0 %381 }
  0xa5   : > { %410 = vst.msk [vmem:[#allocation2 + $0x20] sm:$0xff] %vm405_vm5, %v390_v4  ;;  %406 = vst.msk [vmem:[#allocation2] sm:$0xff] %vm405_vm5, %v382_v5 }
  0xa8   : > { %v245_v6 = vpop.permute.xlu1 %244  ;;  %v237_v7 = vpop.permute.xlu0 %236 }
  0xa9   : > { %263 = vst.msk [vmem:[#allocation2 + $0x30] sm:$0xff] %vm256_vm2, %v245_v6  ;;  %259 = vst.msk [vmem:[#allocation2 + $0x10] sm:$0xff] %vm256_vm2, %v237_v7 }
  0xac   : > { %v392_v8 = vpop.permute.xlu1 %391  ;;  %v384_v9 = vpop.permute.xlu0 %383 }
  0xad   : > { %411 = vst.msk [vmem:[#allocation2 + $0x28] sm:$0xff] %vm405_vm5, %v392_v8  ;;  %407 = vst.msk [vmem:[#allocation2 + $0x8] sm:$0xff] %vm405_vm5, %v384_v9 }
  0xb0   : > { %v439_v10 = vpop.permute.xlu1 %438  ;;  %v431_v11 = vpop.permute.xlu0 %430 }
  0xb1   : > { %459 = vst.msk [vmem:[#allocation2 + $0x20] sm:$0xff] %vm454_vm6, %v439_v10  ;;  %455 = vst.msk [vmem:[#allocation2] sm:$0xff] %vm454_vm6, %v431_v11 }
  0xb4   : > { %v247_v12 = vpop.permute.xlu1 %246  ;;  %v239_v13 = vpop.permute.xlu0 %238 }
  0xb5   : > { %264 = vst.msk [vmem:[#allocation2 + $0x38] sm:$0xff] %vm256_vm2, %v247_v12  ;;  %260 = vst.msk [vmem:[#allocation2 + $0x18] sm:$0xff] %vm256_vm2, %v239_v13 }
  0xb8   : > { %v294_v14 = vpop.permute.xlu1 %293  ;;  %v286_v15 = vpop.permute.xlu0 %285 }
  0xb9   : > { %312 = vst.msk [vmem:[#allocation2 + $0x30] sm:$0xff] %vm305_vm3, %v294_v14  ;;  %308 = vst.msk [vmem:[#allocation2 + $0x10] sm:$0xff] %vm305_vm3, %v286_v15 }
  0xbc   : > { %v441_v16 = vpop.permute.xlu1 %440  ;;  %v433_v17 = vpop.permute.xlu0 %432 }
  0xbd   : > { %460 = vst.msk [vmem:[#allocation2 + $0x28] sm:$0xff] %vm454_vm6, %v441_v16  ;;  %456 = vst.msk [vmem:[#allocation2 + $0x8] sm:$0xff] %vm454_vm6, %v433_v17 }
  0xc0   : > { %v489_v18 = vpop.permute.xlu1 %488  ;;  %v481_v19 = vpop.permute.xlu0 %480 }
  0xc1   : > { %509 = vst.msk [vmem:[#allocation2 + $0x20] sm:$0xff] %vm504_vm7, %v489_v18  ;;  %505 = vst.msk [vmem:[#allocation2] sm:$0xff] %vm504_vm7, %v481_v19 }
  0xc4   : > { %v296_v20 = vpop.permute.xlu1 %295  ;;  %v288_v21 = vpop.permute.xlu0 %287 }
  0xc5   : > { %313 = vst.msk [vmem:[#allocation2 + $0x38] sm:$0xff] %vm305_vm3, %v296_v20  ;;  %309 = vst.msk [vmem:[#allocation2 + $0x18] sm:$0xff] %vm305_vm3, %v288_v21 }
  0xc8   : > { %v344_v22 = vpop.permute.xlu1 %343  ;;  %v336_v23 = vpop.permute.xlu0 %335 }
  0xc9   : > { %362 = vst.msk [vmem:[#allocation2 + $0x30] sm:$0xff] %vm355_vm4, %v344_v22  ;;  %358 = vst.msk [vmem:[#allocation2 + $0x10] sm:$0xff] %vm355_vm4, %v336_v23 }
  0xcc   : > { %v491_v24 = vpop.permute.xlu1 %490  ;;  %v483_v25 = vpop.permute.xlu0 %482 }
  0xcd   : > { %510 = vst.msk [vmem:[#allocation2 + $0x28] sm:$0xff] %vm504_vm7, %v491_v24  ;;  %506 = vst.msk [vmem:[#allocation2 + $0x8] sm:$0xff] %vm504_vm7, %v483_v25 }
  0xd0   : > { %v539_v26 = vpop.permute.xlu1 %538  ;;  %v531_v27 = vpop.permute.xlu0 %530 }
  0xd1   : > { %559 = vst.msk [vmem:[#allocation2 + $0x20] sm:$0xff] %vm554_vm8, %v539_v26  ;;  %555 = vst.msk [vmem:[#allocation2] sm:$0xff] %vm554_vm8, %v531_v27 }
  0xd4   : > { %v346_v28 = vpop.permute.xlu1 %345  ;;  %v338_v29 = vpop.permute.xlu0 %337 }
  0xd5   : > { %363 = vst.msk [vmem:[#allocation2 + $0x38] sm:$0xff] %vm355_vm4, %v346_v28  ;;  %359 = vst.msk [vmem:[#allocation2 + $0x18] sm:$0xff] %vm355_vm4, %v338_v29 }
  0xd8   : > { %v394_v30 = vpop.permute.xlu1 %393  ;;  %v386_v31 = vpop.permute.xlu0 %385 }
  0xd9   : > { %412 = vst.msk [vmem:[#allocation2 + $0x30] sm:$0xff] %vm405_vm5, %v394_v30  ;;  %408 = vst.msk [vmem:[#allocation2 + $0x10] sm:$0xff] %vm405_vm5, %v386_v31 }
  0xdc   : > { %v541_v32 = vpop.permute.xlu1 %540  ;;  %v533_v33 = vpop.permute.xlu0 %532 }
  0xdd   : > { %560 = vst.msk [vmem:[#allocation2 + $0x28] sm:$0xff] %vm554_vm8, %v541_v32  ;;  %556 = vst.msk [vmem:[#allocation2 + $0x8] sm:$0xff] %vm554_vm8, %v533_v33 }
  0xe0   : > { %v588_v34 = vpop.permute.xlu1 %587  ;;  %v580_v35 = vpop.permute.xlu0 %579 }
  0xe1   : > { %608 = vst.msk [vmem:[#allocation2 + $0x20] sm:$0xff] %vm603_vm9, %v588_v34  ;;  %604 = vst.msk [vmem:[#allocation2] sm:$0xff] %vm603_vm9, %v580_v35 }
  0xe4   : > { %v396_v36 = vpop.permute.xlu1 %395  ;;  %v388_v37 = vpop.permute.xlu0 %387 }
  0xe5   : > { %413 = vst.msk [vmem:[#allocation2 + $0x38] sm:$0xff] %vm405_vm5, %v396_v36  ;;  %409 = vst.msk [vmem:[#allocation2 + $0x18] sm:$0xff] %vm405_vm5, %v388_v37 }
  0xe8   : > { %v443_v38 = vpop.permute.xlu1 %442  ;;  %v435_v39 = vpop.permute.xlu0 %434  ;;  %v612_v40 = vld [vmem:[#allocation2] sm:$0xff] }
  0xe9   : > { %v616_v41 = vld [vmem:[#allocation2 + $0x20] sm:$0xff]  ;;  %461 = vst.msk [vmem:[#allocation2 + $0x30] sm:$0xff] %vm454_vm6, %v443_v38  ;;  %457 = vst.msk [vmem:[#allocation2 + $0x10] sm:$0xff] %vm454_vm6, %v435_v39  ;;  %975 = vmatprep.mubr.msk.f32.mxu0 %vm632_vm10, %v612_v40 }
  0xea   : > { %981 = vmatprep.mubr.msk.f32.mxu1 %vm632_vm10, %v616_v41 }
  0xec   : > { %v590_v42 = vpop.permute.xlu1 %589  ;;  %v582_v43 = vpop.permute.xlu0 %581 }
  0xed   : > { %609 = vst.msk [vmem:[#allocation2 + $0x28] sm:$0xff] %vm603_vm9, %v590_v42  ;;  %605 = vst.msk [vmem:[#allocation2 + $0x8] sm:$0xff] %vm603_vm9, %v582_v43 }
  0xf0   : > { %v445_v44 = vpop.permute.xlu1 %444  ;;  %v437_v45 = vpop.permute.xlu0 %436 }
  0xf1   : > { %462 = vst.msk [vmem:[#allocation2 + $0x38] sm:$0xff] %vm454_vm6, %v445_v44  ;;  %458 = vst.msk [vmem:[#allocation2 + $0x18] sm:$0xff] %vm454_vm6, %v437_v45 }
  0xf4   : > { %v493_v46 = vpop.permute.xlu1 %492  ;;  %v485_v47 = vpop.permute.xlu0 %484  ;;  %v613_v48 = vld [vmem:[#allocation2 + $0x8] sm:$0xff] }
  0xf5   : > { %v617_v49 = vld [vmem:[#allocation2 + $0x28] sm:$0xff]  ;;  %511 = vst.msk [vmem:[#allocation2 + $0x30] sm:$0xff] %vm504_vm7, %v493_v46  ;;  %507 = vst.msk [vmem:[#allocation2 + $0x10] sm:$0xff] %vm504_vm7, %v485_v47  ;;  %976 = vmatmul.mubr.msk.f32.vlgmr.msra.gmra.mxu0 %vm632_vm10, %v613_v48 }
  0xf6   : > { %982 = vmatmul.mubr.msk.f32.vlgmr.msra.gmra.mxu1 %vm632_vm10, %v617_v49 }
  0xf8   : > { %v495_v50 = vpop.permute.xlu1 %494  ;;  %v487_v51 = vpop.permute.xlu0 %486 }
  0xf9   : > { %512 = vst.msk [vmem:[#allocation2 + $0x38] sm:$0xff] %vm504_vm7, %v495_v50  ;;  %508 = vst.msk [vmem:[#allocation2 + $0x18] sm:$0xff] %vm504_vm7, %v487_v51 }
  0xfc   : > { %v543_v52 = vpop.permute.xlu1 %542  ;;  %v535_v53 = vpop.permute.xlu0 %534 }
  0xfd   : > { %561 = vst.msk [vmem:[#allocation2 + $0x30] sm:$0xff] %vm554_vm8, %v543_v52  ;;  %557 = vst.msk [vmem:[#allocation2 + $0x10] sm:$0xff] %vm554_vm8, %v535_v53 }
 0x100   : > { %v545_v54 = vpop.permute.xlu1 %544  ;;  %v537_v55 = vpop.permute.xlu0 %536 }
 0x101   : > { %562 = vst.msk [vmem:[#allocation2 + $0x38] sm:$0xff] %vm554_vm8, %v545_v54  ;;  %558 = vst.msk [vmem:[#allocation2 + $0x18] sm:$0xff] %vm554_vm8, %v537_v55 }
 0x104   : > { %v592_v56 = vpop.permute.xlu1 %591  ;;  %v584_v57 = vpop.permute.xlu0 %583 }
 0x105   : > { %610 = vst.msk [vmem:[#allocation2 + $0x30] sm:$0xff] %vm603_vm9, %v592_v56  ;;  %606 = vst.msk [vmem:[#allocation2 + $0x10] sm:$0xff] %vm603_vm9, %v584_v57 }
 0x108   : > { %v594_v58 = vpop.permute.xlu1 %593  ;;  %v586_v59 = vpop.permute.xlu0 %585 }
 0x109   : > { %611 = vst.msk [vmem:[#allocation2 + $0x38] sm:$0xff] %vm603_vm9, %v594_v58  ;;  %607 = vst.msk [vmem:[#allocation2 + $0x18] sm:$0xff] %vm603_vm9, %v586_v59 }
 0x10c   : > { %v614_v60 = vld [vmem:[#allocation2 + $0x10] sm:$0xff] }
 0x10d   : > { %v618_v61 = vld [vmem:[#allocation2 + $0x30] sm:$0xff]  ;;  %978 = vmatprep.mubr.msk.f32.mxu0 %vm632_vm10, %v614_v60 }
 0x10e   : > { %984 = vmatprep.mubr.msk.f32.mxu1 %vm632_vm10, %v618_v61 }
 0x110   : > { %v615_v62 = vld [vmem:[#allocation2 + $0x18] sm:$0xff] }
 0x111   : > { %v619_v63 = vld [vmem:[#allocation2 + $0x38] sm:$0xff]  ;;  %979 = vmatmul.mubr.msk.f32.gmra.mxu0 %vm632_vm10, %v615_v62 }
 0x112   : > { %985 = vmatmul.mubr.msk.f32.gmra.mxu1 %vm632_vm10, %v619_v63 }
 0x1b5   : > { %v977_v1 = vpop.f32.mrf.mxu0 }
 0x1b6   : > { %v983_v2 = vpop.f32.mrf.mxu1  ;;  %v733_v3 = vadd.f32 %v977_v1, %v936_v0 }
 0x1b7   : > { %v753_v4 = vadd.f32 %v983_v2, %v936_v0  ;;  %v727_v5 = vpop.f32.mrf.mxu0 }
 0x1b8   : > { %v747_v6 = vpop.f32.mrf.mxu1  ;;  %768 = vst.msk [vmem:[%s187_s10 + $0x8] sm:$0xff] %vm766_vm11, %v733_v3  ;;  %v728_v7 = vadd.f32 %v936_v0, %v727_v5 }
 0x1b9   : > { %772 = vst.msk [vmem:[%s187_s10 + $0x28] sm:$0xff] %vm766_vm11, %v753_v4  ;;  %v748_v8 = vadd.f32 %v936_v0, %v747_v6 }
 0x1ba   : > { %767 = vst.msk [vmem:[%s187_s10] sm:$0xff] %vm766_vm11, %v728_v7 }
 0x1bb   : > { %771 = vst.msk [vmem:[%s187_s10 + $0x20] sm:$0xff] %vm766_vm11, %v748_v8 }
 0x1d1   : > { %v980_v9 = vpop.f32.mrf.mxu0 }
 0x1d2   : > { %v986_v10 = vpop.f32.mrf.mxu1  ;;  %v743_v11 = vadd.f32 %v980_v9, %v936_v0 }
 0x1d3   : > { %v763_v12 = vadd.f32 %v986_v10, %v936_v0  ;;  %v737_v13 = vpop.f32.mrf.mxu0 }
 0x1d4   : > { %v757_v14 = vpop.f32.mrf.mxu1  ;;  %770 = vst.msk [vmem:[%s187_s10 + $0x18] sm:$0xff] %vm766_vm11, %v743_v11  ;;  %v738_v15 = vadd.f32 %v936_v0, %v737_v13 }
 0x1d5   : > { %774 = vst.msk [vmem:[%s187_s10 + $0x38] sm:$0xff] %vm766_vm11, %v763_v12  ;;  %v758_v16 = vadd.f32 %v936_v0, %v757_v14 }
 0x1d6   : > { %769 = vst.msk [vmem:[%s187_s10 + $0x10] sm:$0xff] %vm766_vm11, %v738_v15 }
 0x1d7   : > { %773 = vst.msk [vmem:[%s187_s10 + $0x30] sm:$0xff] %vm766_vm11, %v758_v16 }
 0x1d8   : > { %1075 = shalt.err (!%p1072_p5)
}
 0x1d9   : > { %s1076_s4 = scalar_lea.hbm %s1524_s23, 1024  ;;  %s1080_s7 = scalar_lea.hbm %s1583_s3, 2048 }
 0x1da   : > { %p1077_p6 = scmp.ne.s32.totalorder %s1524_s23, %s1076_s4  ;;  %p1081_p10 = scmp.lt.s32.totalorder %s1524_s23, %s1583_s3 }
 0x1db   : > { %p1082_p11 = scmp.lt.s32.totalorder %s1080_s7, %s1076_s4 }
 0x1dc   : > { %p1078_p7 = pnand %p1077_p6, %p1210_p4 }
 0x1dd   : > { %p1083_p12 = por %p1082_p11, %p1081_p10 }
 0x1de   : > { %p1079_p9 = pneg %p1078_p7 }
 0x1e0   : > { %p1084_p13 = pnand %p1083_p12, %p1079_p9 }
 0x1e2   : > { %1087 = shalt.err (!%p1084_p13)
}
 0x1e3   : > { %s1149_s10 = smov 128  }
 0x1e4   : > { %998 = dma.vmem_to_hbm [thread:$0]  (%p1210_p4), %s1528_s18, 1024, %s1524_s23, %s1534_s15, %s1149_s10, %s1149_s10, %s1141_s5  }
 0x1e5 PF: > { %p1004_p0 = scmp.ge.s32.totalorder %s1138_s17, 2  ;;  %s806_s11 = sand.u32 1, %s1118_s12  }
 0x1e6   : > { %s807_s19 = scalar_lea.sflag [#allocation4], %s806_s11 }
 0x1e7   : > { %p1001_p1 = pnand %p1004_p0, %p1217_p8 }
 0x1e9   : > { %p1002_p2 = pneg %p1001_p1 }
 0x1eb   : > { %1113 = dma.done.wait (%p1002_p2), %s807_s19, 1024  }
 0x1ec   : > { %1115 = vsyncadd (%p1002_p2), %s807_s19, 4294966272  ;;  %s16_s17 = sadd.s32 1, %s1138_s17   ;;  %s1586_s12 = smov %s1122_s13 }
 0x1ed   : > { %p13_p3 = scmp.ge.s32.totalorder %s16_s17, 4   ;;  %s1587_s13 = smov %s1126_s14 }
 0x1ee   : > { %s1588_s14 = smov %s1223_s25  ;;  %s1589_s15 = smov %s1134_s16 }
 0x1ef   : > { %s1590_s16 = smov %s1592_s20  ;;  %15 = sbr.rel (!%p13_p3) target bundleno = 4 (0x4), region = 72 }
 0x1f4   :  { %812 = vsyncpa [#allocation4], 1 }
 0x1f5   :  { %814 = vsyncpa [#allocation4 + $0x1], 1 }

</bundles_post_ra>
